<compile_context>
chip_gen: v7x
topology: tpu7x:2x2x1
jax: 0.10.0
libtpu: 0.0.40
codegen_flags: <defaults>
</compile_context>

<pallas_src>
import math

import jax
import jax.numpy as jnp
from jax import lax
from jax.experimental import pallas as pl
from jax.experimental.pallas import tpu as pltpu

# ---------------- model config (small, consistent with the module) -----------
WORDS_NUM = 100        # vocab size
WORDS_DIM = 32         # D  (embedding dim)
OUTPUT_CHANNEL = 8     # C  (conv output channels)
NUM_CLASSES = 10       # target_class
NUM_BOTTLENECK = 32    # num_bottleneck_hidden
POOL_LEN = 4           # dynamic_pool_length
SEQ_LEN = 16           # L  (words per document)
BATCH = 2

KS = 3                                     # number of conv branches
CONVS = [(2, 1), (4, 3), (8, 7)]           # (kernel_height, padding) per branch
MAXPAD = max(p for _, p in CONVS)          # 7: pad the embedding once with max pad
MAXTAP = max(k for k, _ in CONVS)          # 8: taps after fusing the branches
LALIGN = 32                                # L + 2*MAXPAD = 30 padded to sublane multiple
OUT_PAD = 128                              # lane-dense width of the logits store


def adaptive_bounds(length, p):
    """PyTorch AdaptiveMaxPool1d bin boundaries (static)."""
    return [(math.floor(i * length / p), math.ceil((i + 1) * length / p))
            for i in range(p)]


# ---------------- Pallas kernel ----------------------------------------------
def xmlcnn_forward_pallas(x_flat, wcat, bcat, wb_r, bb, wf_pad, bf_pad):
    """x_flat: (B*LALIGN + MAXTAP, D) f32 padded/flattened embeddings.

    Returns logits (B, NUM_CLASSES)."""
    B, C, H = BATCH, OUTPUT_CHANNEL, NUM_BOTTLENECK
    NCOL = KS * C                      # 24 fused conv output channels
    TM = B * LALIGN                    # 64 rows: batch folded into the matmul M dim

    # static pooling bins per branch, in the shared time coordinate t
    bin_bounds = []
    for kh, ph in CONVS:
        T = SEQ_LEN + 2 * ph - kh + 1
        bin_bounds.append(adaptive_bounds(T, POOL_LEN))

    def kernel(x_ref, wc_ref, bc_ref, wbr_ref, bb_ref, wf_ref, bf_ref, o_ref):
        # ---- fused conv: all branches + whole batch, 8 matmuls (64,32)@(32,24)
        acc = jnp.dot(x_ref[0:TM, :], wc_ref[0],
                      preferred_element_type=jnp.float32)
        for u in range(1, MAXTAP):
            acc = acc + jnp.dot(x_ref[u:u + TM, :], wc_ref[u],
                                preferred_element_type=jnp.float32)
        h = jnp.maximum(acc + bc_ref[...], 0.0)            # (TM, 3C) relu(conv)

        # per-batch (32, 3C) row blocks (sublane-aligned static slices)
        h_blocks = [h[b * LALIGN:(b + 1) * LALIGN, :] for b in range(B)]

        # ---- adaptive max pool via masked full-tile reductions, folded
        # ---- directly into the bottleneck as a sum over the POOL_LEN bins
        row = lax.broadcasted_iota(jnp.int32, (LALIGN, NCOL), 0)
        col = lax.broadcasted_iota(jnp.int32, (LALIGN, NCOL), 1)

        hb = None
        for i in range(POOL_LEN):
            s0, e0 = bin_bounds[0][i]
            s1, e1 = bin_bounds[1][i]
            s2, e2 = bin_bounds[2][i]
            lo = jnp.where(col < C, s0, jnp.where(col < 2 * C, s1, s2))
            hi = jnp.where(col < C, e0, jnp.where(col < 2 * C, e1, e2))
            mask = (row >= lo) & (row < hi)
            pooled = jnp.concatenate(
                [jnp.max(jnp.where(mask, blk, -1e30), axis=0, keepdims=True)
                 for blk in h_blocks], axis=0)              # (B, 3C)
            contrib = jnp.dot(pooled, wbr_ref[i],
                              preferred_element_type=jnp.float32)
            hb = contrib if hb is None else hb + contrib

        # ---- bottleneck ReLU (dropout p=0 -> identity) + final Linear ----
        hb = jnp.maximum(hb + bb_ref[...], 0.0)             # (B, H)
        o_ref[...] = (jnp.dot(hb, wf_ref[...],
                              preferred_element_type=jnp.float32)
                      + bf_ref[...])                        # (B, 128) dense store

    def vmem():
        return pl.BlockSpec(memory_space=pltpu.MemorySpace.VMEM)

    out = pl.pallas_call(
        kernel,
        out_shape=jax.ShapeDtypeStruct((B, OUT_PAD), jnp.float32),
        in_specs=[vmem() for _ in range(7)],
        out_specs=vmem(),
    )(x_flat, wcat, bcat, wb_r, bb, wf_pad, bf_pad)
    return out[:, :NUM_CLASSES]


# ---------------- deterministic parameter init (PyTorch-style shapes) ---------
def init_params(key):
    ks = jax.random.split(key, 11)
    C, D = OUTPUT_CHANNEL, WORDS_DIM
    params = {}
    # mode='rand': uniform(-0.25, 0.25) embedding
    params["embed"] = jax.random.uniform(ks[0], (WORDS_NUM, D), jnp.float32,
                                         -0.25, 0.25)
    convs = []
    for i, (kh, _) in enumerate(CONVS):
        bound = 1.0 / math.sqrt(1 * kh * D)
        w = jax.random.uniform(ks[1 + 2 * i], (C, 1, kh, D), jnp.float32,
                               -bound, bound)
        b = jax.random.uniform(ks[2 + 2 * i], (C,), jnp.float32, -bound, bound)
        convs.append((w, b))
    params["convs"] = convs
    fin = KS * C * POOL_LEN
    bound = 1.0 / math.sqrt(fin)
    params["wb"] = jax.random.uniform(ks[7], (NUM_BOTTLENECK, fin), jnp.float32,
                                      -bound, bound)
    params["bb"] = jax.random.uniform(ks[8], (NUM_BOTTLENECK,), jnp.float32,
                                      -bound, bound)
    bound = 1.0 / math.sqrt(NUM_BOTTLENECK)
    params["wf"] = jax.random.uniform(ks[9], (NUM_CLASSES, NUM_BOTTLENECK),
                                      jnp.float32, -bound, bound)
    params["bf"] = jax.random.uniform(ks[10], (NUM_CLASSES,), jnp.float32,
                                      -bound, bound)
    return params


# ---------------- pure-JAX reference (PyTorch semantics) ----------------------
def reference(x_ids, params):
    emb = params["embed"][x_ids]                                   # (B, L, D)
    feats = []
    for (w, b), (kh, ph) in zip(params["convs"], CONVS):
        xp = jnp.pad(emb, ((0, 0), (ph, ph), (0, 0)))
        T = SEQ_LEN + 2 * ph - kh + 1
        out = jnp.zeros((BATCH, OUTPUT_CHANNEL, T), jnp.float32)
        for dh in range(kh):
            out = out + jnp.einsum('bld,cd->bcl', xp[:, dh:dh + T, :],
                                   w[:, 0, dh, :])
        out = jax.nn.relu(out + b[None, :, None])                  # (B, C, T)
        bounds = adaptive_bounds(T, POOL_LEN)
        pooled = jnp.stack([jnp.max(out[:, :, s:e], axis=2) for s, e in bounds],
                           axis=2)                                 # (B, C, p)
        feats.append(pooled.reshape(BATCH, -1))                    # channel-major
    feat = jnp.concatenate(feats, axis=1)                          # (B, KS*C*p)
    hb = jax.nn.relu(feat @ params["wb"].T + params["bb"])
    return hb @ params["wf"].T + params["bf"]


# ---------------- driver -------------------------------------------------------
if __name__ == "__main__":
    key = jax.random.PRNGKey(0)
    kp, kx = jax.random.split(key)
    params = init_params(kp)

    # integer token ids (the module does x.long() then embeds)
    x_ids = jax.random.randint(kx, (BATCH, SEQ_LEN), 0, WORDS_NUM)

    # ---- host-side glue: embedding lookup + layout packing for the kernel ----
    emb = params["embed"][x_ids]                                   # (B, L, D)
    C, D, H = OUTPUT_CHANNEL, WORDS_DIM, NUM_BOTTLENECK

    # pad each document to a 32-row (sublane-aligned) block that already holds
    # the conv zero-padding, flatten the batch into rows, and append MAXTAP
    # trailing zero rows so every shifted window stays in-bounds.
    x_al = jnp.pad(emb, ((0, 0), (MAXPAD, LALIGN - SEQ_LEN - MAXPAD), (0, 0)))
    x_flat = jnp.pad(x_al.reshape(BATCH * LALIGN, D), ((0, MAXTAP), (0, 0)))

    # fuse the 3 conv branches into one (MAXTAP, D, KS*C) tap-weight tensor:
    # branch k (kernel kh, pad ph) occupies taps u = MAXPAD-ph .. MAXPAD-ph+kh-1.
    wcat = jnp.zeros((MAXTAP, D, KS * C), jnp.float32)
    bcat = []
    for k, ((kh, ph), (w, b)) in enumerate(zip(CONVS, params["convs"])):
        off = MAXPAD - ph
        for dh in range(kh):
            wcat = wcat.at[off + dh, :, k * C:(k + 1) * C].set(w[:, 0, dh, :].T)
        bcat.append(b)
    bcat = jnp.concatenate(bcat).reshape(1, KS * C)

    # bottleneck weight regrouped by pooling bin: (p, KS*C, H).
    # PyTorch flattens pooled features as k*C*p + c*p + i.
    wb_r = (params["wb"].T.reshape(KS, C, POOL_LEN, H)
            .transpose(2, 0, 1, 3).reshape(POOL_LEN, KS * C, H))
    bb = params["bb"].reshape(1, H)

    # final Linear padded to a lane-dense 128-wide store (sliced back below)
    wf_pad = jnp.zeros((H, OUT_PAD), jnp.float32).at[:, :NUM_CLASSES].set(
        params["wf"].T)
    bf_pad = jnp.zeros((1, OUT_PAD), jnp.float32).at[0, :NUM_CLASSES].set(
        params["bf"])

    logits = xmlcnn_forward_pallas(x_flat, wcat, bcat, wb_r, bb, wf_pad, bf_pad)
    logits = jax.block_until_ready(logits)

    ref = reference(x_ids, params)
    assert logits.shape == (BATCH, NUM_CLASSES)
    assert jnp.allclose(logits, ref, atol=1e-4, rtol=1e-4), (
        f"mismatch: max abs err {jnp.max(jnp.abs(logits - ref))}")

    # TODO(synk): the torch module also returns (y, None, None, fc1.weight) for
    # the training loop; only the logits are compute and are produced here.
    print("KERNEL_OK")
</pallas_src>

<mosaic_0001>
module attributes {stable_mosaic.version = 11 : i64} {
  func.func @kernel(%arg0: memref<72x32xf32, #tpu.memory_space<vmem>>, %arg1: memref<8x32x24xf32, #tpu.memory_space<vmem>>, %arg2: memref<1x24xf32, #tpu.memory_space<vmem>>, %arg3: memref<4x24x32xf32, #tpu.memory_space<vmem>>, %arg4: memref<1x32xf32, #tpu.memory_space<vmem>>, %arg5: memref<32x128xf32, #tpu.memory_space<vmem>>, %arg6: memref<1x128xf32, #tpu.memory_space<vmem>>, %arg7: memref<2x128xf32, #tpu.memory_space<vmem>>) attributes {dimension_semantics = [], scalar_prefetch = 0 : i64, scratch_operands = 0 : i64, tpu.core_type = #tpu.core_type<tc>} {
    %c0 = arith.constant 0 : index
    %c0_0 = arith.constant 0 : index
    %0 = vector.load %arg0[%c0, %c0_0] : memref<72x32xf32, #tpu.memory_space<vmem>>, vector<64x32xf32>
    %c0_1 = arith.constant 0 : index
    %c0_2 = arith.constant 0 : index
    %c0_3 = arith.constant 0 : index
    %1 = vector.load %arg1[%c0_1, %c0_2, %c0_3] : memref<8x32x24xf32, #tpu.memory_space<vmem>>, vector<1x32x24xf32>
    %2 = vector.shape_cast %1 : vector<1x32x24xf32> to vector<32x24xf32>
    %cst = arith.constant dense<0.000000e+00> : vector<64x24xf32>
    %3 = tpu.matmul %0, %2, %cst {dimension_numbers = #tpu.dot_dimension_numbers<[1], [0], [0], [1], [0, 0, 1, 1], [], []>} : vector<64x32xf32>, vector<32x24xf32>, vector<64x24xf32> -> vector<64x24xf32>
    %c1 = arith.constant 1 : index
    %c0_4 = arith.constant 0 : index
    %4 = vector.load %arg0[%c1, %c0_4] : memref<72x32xf32, #tpu.memory_space<vmem>>, vector<64x32xf32>
    %c1_5 = arith.constant 1 : index
    %c0_6 = arith.constant 0 : index
    %c0_7 = arith.constant 0 : index
    %5 = vector.load %arg1[%c1_5, %c0_6, %c0_7] : memref<8x32x24xf32, #tpu.memory_space<vmem>>, vector<1x32x24xf32>
    %6 = vector.shape_cast %5 : vector<1x32x24xf32> to vector<32x24xf32>
    %cst_8 = arith.constant dense<0.000000e+00> : vector<64x24xf32>
    %7 = tpu.matmul %4, %6, %cst_8 {dimension_numbers = #tpu.dot_dimension_numbers<[1], [0], [0], [1], [0, 0, 1, 1], [], []>} : vector<64x32xf32>, vector<32x24xf32>, vector<64x24xf32> -> vector<64x24xf32>
    %8 = arith.addf %3, %7 : vector<64x24xf32>
    %c2 = arith.constant 2 : index
    %c0_9 = arith.constant 0 : index
    %9 = vector.load %arg0[%c2, %c0_9] : memref<72x32xf32, #tpu.memory_space<vmem>>, vector<64x32xf32>
    %c2_10 = arith.constant 2 : index
    %c0_11 = arith.constant 0 : index
    %c0_12 = arith.constant 0 : index
    %10 = vector.load %arg1[%c2_10, %c0_11, %c0_12] : memref<8x32x24xf32, #tpu.memory_space<vmem>>, vector<1x32x24xf32>
    %11 = vector.shape_cast %10 : vector<1x32x24xf32> to vector<32x24xf32>
    %cst_13 = arith.constant dense<0.000000e+00> : vector<64x24xf32>
    %12 = tpu.matmul %9, %11, %cst_13 {dimension_numbers = #tpu.dot_dimension_numbers<[1], [0], [0], [1], [0, 0, 1, 1], [], []>} : vector<64x32xf32>, vector<32x24xf32>, vector<64x24xf32> -> vector<64x24xf32>
    %13 = arith.addf %8, %12 : vector<64x24xf32>
    %c3 = arith.constant 3 : index
    %c0_14 = arith.constant 0 : index
    %14 = vector.load %arg0[%c3, %c0_14] : memref<72x32xf32, #tpu.memory_space<vmem>>, vector<64x32xf32>
    %c3_15 = arith.constant 3 : index
    %c0_16 = arith.constant 0 : index
    %c0_17 = arith.constant 0 : index
    %15 = vector.load %arg1[%c3_15, %c0_16, %c0_17] : memref<8x32x24xf32, #tpu.memory_space<vmem>>, vector<1x32x24xf32>
    %16 = vector.shape_cast %15 : vector<1x32x24xf32> to vector<32x24xf32>
    %cst_18 = arith.constant dense<0.000000e+00> : vector<64x24xf32>
    %17 = tpu.matmul %14, %16, %cst_18 {dimension_numbers = #tpu.dot_dimension_numbers<[1], [0], [0], [1], [0, 0, 1, 1], [], []>} : vector<64x32xf32>, vector<32x24xf32>, vector<64x24xf32> -> vector<64x24xf32>
    %18 = arith.addf %13, %17 : vector<64x24xf32>
    %c4 = arith.constant 4 : index
    %c0_19 = arith.constant 0 : index
    %19 = vector.load %arg0[%c4, %c0_19] : memref<72x32xf32, #tpu.memory_space<vmem>>, vector<64x32xf32>
    %c4_20 = arith.constant 4 : index
    %c0_21 = arith.constant 0 : index
    %c0_22 = arith.constant 0 : index
    %20 = vector.load %arg1[%c4_20, %c0_21, %c0_22] : memref<8x32x24xf32, #tpu.memory_space<vmem>>, vector<1x32x24xf32>
    %21 = vector.shape_cast %20 : vector<1x32x24xf32> to vector<32x24xf32>
    %cst_23 = arith.constant dense<0.000000e+00> : vector<64x24xf32>
    %22 = tpu.matmul %19, %21, %cst_23 {dimension_numbers = #tpu.dot_dimension_numbers<[1], [0], [0], [1], [0, 0, 1, 1], [], []>} : vector<64x32xf32>, vector<32x24xf32>, vector<64x24xf32> -> vector<64x24xf32>
    %23 = arith.addf %18, %22 : vector<64x24xf32>
    %c5 = arith.constant 5 : index
    %c0_24 = arith.constant 0 : index
    %24 = vector.load %arg0[%c5, %c0_24] : memref<72x32xf32, #tpu.memory_space<vmem>>, vector<64x32xf32>
    %c5_25 = arith.constant 5 : index
    %c0_26 = arith.constant 0 : index
    %c0_27 = arith.constant 0 : index
    %25 = vector.load %arg1[%c5_25, %c0_26, %c0_27] : memref<8x32x24xf32, #tpu.memory_space<vmem>>, vector<1x32x24xf32>
    %26 = vector.shape_cast %25 : vector<1x32x24xf32> to vector<32x24xf32>
    %cst_28 = arith.constant dense<0.000000e+00> : vector<64x24xf32>
    %27 = tpu.matmul %24, %26, %cst_28 {dimension_numbers = #tpu.dot_dimension_numbers<[1], [0], [0], [1], [0, 0, 1, 1], [], []>} : vector<64x32xf32>, vector<32x24xf32>, vector<64x24xf32> -> vector<64x24xf32>
    %28 = arith.addf %23, %27 : vector<64x24xf32>
    %c6 = arith.constant 6 : index
    %c0_29 = arith.constant 0 : index
    %29 = vector.load %arg0[%c6, %c0_29] : memref<72x32xf32, #tpu.memory_space<vmem>>, vector<64x32xf32>
    %c6_30 = arith.constant 6 : index
    %c0_31 = arith.constant 0 : index
    %c0_32 = arith.constant 0 : index
    %30 = vector.load %arg1[%c6_30, %c0_31, %c0_32] : memref<8x32x24xf32, #tpu.memory_space<vmem>>, vector<1x32x24xf32>
    %31 = vector.shape_cast %30 : vector<1x32x24xf32> to vector<32x24xf32>
    %cst_33 = arith.constant dense<0.000000e+00> : vector<64x24xf32>
    %32 = tpu.matmul %29, %31, %cst_33 {dimension_numbers = #tpu.dot_dimension_numbers<[1], [0], [0], [1], [0, 0, 1, 1], [], []>} : vector<64x32xf32>, vector<32x24xf32>, vector<64x24xf32> -> vector<64x24xf32>
    %33 = arith.addf %28, %32 : vector<64x24xf32>
    %c7 = arith.constant 7 : index
    %c0_34 = arith.constant 0 : index
    %34 = vector.load %arg0[%c7, %c0_34] : memref<72x32xf32, #tpu.memory_space<vmem>>, vector<64x32xf32>
    %c7_35 = arith.constant 7 : index
    %c0_36 = arith.constant 0 : index
    %c0_37 = arith.constant 0 : index
    %35 = vector.load %arg1[%c7_35, %c0_36, %c0_37] : memref<8x32x24xf32, #tpu.memory_space<vmem>>, vector<1x32x24xf32>
    %36 = vector.shape_cast %35 : vector<1x32x24xf32> to vector<32x24xf32>
    %cst_38 = arith.constant dense<0.000000e+00> : vector<64x24xf32>
    %37 = tpu.matmul %34, %36, %cst_38 {dimension_numbers = #tpu.dot_dimension_numbers<[1], [0], [0], [1], [0, 0, 1, 1], [], []>} : vector<64x32xf32>, vector<32x24xf32>, vector<64x24xf32> -> vector<64x24xf32>
    %38 = arith.addf %33, %37 : vector<64x24xf32>
    %c0_39 = arith.constant 0 : index
    %c0_40 = arith.constant 0 : index
    %39 = vector.load %arg2[%c0_39, %c0_40] : memref<1x24xf32, #tpu.memory_space<vmem>>, vector<1x24xf32>
    %40 = vector.broadcast %39 : vector<1x24xf32> to vector<64x24xf32>
    %41 = arith.addf %38, %40 : vector<64x24xf32>
    %cst_41 = arith.constant 0.000000e+00 : f32
    %42 = vector.broadcast %cst_41 : f32 to vector<64x24xf32>
    %43 = arith.maximumf %41, %42 : vector<64x24xf32>
    %44 = vector.extract_strided_slice %43 {offsets = [0, 0], sizes = [32, 24], strides = [1, 1]} : vector<64x24xf32> to vector<32x24xf32>
    %45 = vector.extract_strided_slice %43 {offsets = [32, 0], sizes = [32, 24], strides = [1, 1]} : vector<64x24xf32> to vector<32x24xf32>
    %46 = tpu.iota {dimensions = array<i32: 0>} : vector<32x24xi32>
    %47 = tpu.iota {dimensions = array<i32: 1>} : vector<32x24xi32>
    %c8_i32 = arith.constant 8 : i32
    %48 = vector.broadcast %c8_i32 : i32 to vector<32x24xi32>
    %49 = arith.cmpi slt, %47, %48 : vector<32x24xi32>
    %c16_i32 = arith.constant 16 : i32
    %50 = vector.broadcast %c16_i32 : i32 to vector<32x24xi32>
    %51 = arith.cmpi slt, %47, %50 : vector<32x24xi32>
    %c0_i32 = arith.constant 0 : i32
    %c0_i32_42 = arith.constant 0 : i32
    %52 = vector.broadcast %c0_i32 : i32 to vector<32x24xi32>
    %53 = vector.broadcast %c0_i32_42 : i32 to vector<32x24xi32>
    %54 = arith.select %51, %52, %53 : vector<32x24xi1>, vector<32x24xi32>
    %c0_i32_43 = arith.constant 0 : i32
    %55 = vector.broadcast %c0_i32_43 : i32 to vector<32x24xi32>
    %56 = arith.select %49, %55, %54 : vector<32x24xi1>, vector<32x24xi32>
    %c8_i32_44 = arith.constant 8 : i32
    %57 = vector.broadcast %c8_i32_44 : i32 to vector<32x24xi32>
    %58 = arith.cmpi slt, %47, %57 : vector<32x24xi32>
    %c16_i32_45 = arith.constant 16 : i32
    %59 = vector.broadcast %c16_i32_45 : i32 to vector<32x24xi32>
    %60 = arith.cmpi slt, %47, %59 : vector<32x24xi32>
    %c5_i32 = arith.constant 5 : i32
    %c6_i32 = arith.constant 6 : i32
    %61 = vector.broadcast %c5_i32 : i32 to vector<32x24xi32>
    %62 = vector.broadcast %c6_i32 : i32 to vector<32x24xi32>
    %63 = arith.select %60, %61, %62 : vector<32x24xi1>, vector<32x24xi32>
    %c5_i32_46 = arith.constant 5 : i32
    %64 = vector.broadcast %c5_i32_46 : i32 to vector<32x24xi32>
    %65 = arith.select %58, %64, %63 : vector<32x24xi1>, vector<32x24xi32>
    %66 = arith.cmpi sge, %46, %56 : vector<32x24xi32>
    %67 = arith.cmpi slt, %46, %65 : vector<32x24xi32>
    %68 = arith.andi %66, %67 : vector<32x24xi1>
    %cst_47 = arith.constant -1.000000e+30 : f32
    %69 = vector.broadcast %cst_47 : f32 to vector<32x24xf32>
    %70 = arith.select %68, %44, %69 : vector<32x24xi1>, vector<32x24xf32>
    %cst_48 = arith.constant dense<0xFF800000> : vector<24xf32>
    %71 = vector.multi_reduction <maximumf>, %70, %cst_48 [0] : vector<32x24xf32> to vector<24xf32>
    %72 = vector.shape_cast %71 : vector<24xf32> to vector<1x24xf32>
    %cst_49 = arith.constant -1.000000e+30 : f32
    %73 = vector.broadcast %cst_49 : f32 to vector<32x24xf32>
    %74 = arith.select %68, %45, %73 : vector<32x24xi1>, vector<32x24xf32>
    %cst_50 = arith.constant dense<0xFF800000> : vector<24xf32>
    %75 = vector.multi_reduction <maximumf>, %74, %cst_50 [0] : vector<32x24xf32> to vector<24xf32>
    %76 = vector.shape_cast %75 : vector<24xf32> to vector<1x24xf32>
    %77 = tpu.concatenate %72, %76 in 0 : vector<1x24xf32>, vector<1x24xf32> -> vector<2x24xf32>
    %c0_51 = arith.constant 0 : index
    %c0_52 = arith.constant 0 : index
    %c0_53 = arith.constant 0 : index
    %78 = vector.load %arg3[%c0_51, %c0_52, %c0_53] : memref<4x24x32xf32, #tpu.memory_space<vmem>>, vector<1x24x32xf32>
    %79 = vector.shape_cast %78 : vector<1x24x32xf32> to vector<24x32xf32>
    %cst_54 = arith.constant dense<0.000000e+00> : vector<2x32xf32>
    %80 = tpu.matmul %77, %79, %cst_54 {dimension_numbers = #tpu.dot_dimension_numbers<[1], [0], [0], [1], [0, 0, 1, 1], [], []>} : vector<2x24xf32>, vector<24x32xf32>, vector<2x32xf32> -> vector<2x32xf32>
    %c8_i32_55 = arith.constant 8 : i32
    %81 = vector.broadcast %c8_i32_55 : i32 to vector<32x24xi32>
    %82 = arith.cmpi slt, %47, %81 : vector<32x24xi32>
    %c16_i32_56 = arith.constant 16 : i32
    %83 = vector.broadcast %c16_i32_56 : i32 to vector<32x24xi32>
    %84 = arith.cmpi slt, %47, %83 : vector<32x24xi32>
    %c4_i32 = arith.constant 4 : i32
    %c5_i32_57 = arith.constant 5 : i32
    %85 = vector.broadcast %c4_i32 : i32 to vector<32x24xi32>
    %86 = vector.broadcast %c5_i32_57 : i32 to vector<32x24xi32>
    %87 = arith.select %84, %85, %86 : vector<32x24xi1>, vector<32x24xi32>
    %c4_i32_58 = arith.constant 4 : i32
    %88 = vector.broadcast %c4_i32_58 : i32 to vector<32x24xi32>
    %89 = arith.select %82, %88, %87 : vector<32x24xi1>, vector<32x24xi32>
    %c8_i32_59 = arith.constant 8 : i32
    %90 = vector.broadcast %c8_i32_59 : i32 to vector<32x24xi32>
    %91 = arith.cmpi slt, %47, %90 : vector<32x24xi32>
    %c16_i32_60 = arith.constant 16 : i32
    %92 = vector.broadcast %c16_i32_60 : i32 to vector<32x24xi32>
    %93 = arith.cmpi slt, %47, %92 : vector<32x24xi32>
    %c10_i32 = arith.constant 10 : i32
    %c12_i32 = arith.constant 12 : i32
    %94 = vector.broadcast %c10_i32 : i32 to vector<32x24xi32>
    %95 = vector.broadcast %c12_i32 : i32 to vector<32x24xi32>
    %96 = arith.select %93, %94, %95 : vector<32x24xi1>, vector<32x24xi32>
    %c9_i32 = arith.constant 9 : i32
    %97 = vector.broadcast %c9_i32 : i32 to vector<32x24xi32>
    %98 = arith.select %91, %97, %96 : vector<32x24xi1>, vector<32x24xi32>
    %99 = arith.cmpi sge, %46, %89 : vector<32x24xi32>
    %100 = arith.cmpi slt, %46, %98 : vector<32x24xi32>
    %101 = arith.andi %99, %100 : vector<32x24xi1>
    %cst_61 = arith.constant -1.000000e+30 : f32
    %102 = vector.broadcast %cst_61 : f32 to vector<32x24xf32>
    %103 = arith.select %101, %44, %102 : vector<32x24xi1>, vector<32x24xf32>
    %cst_62 = arith.constant dense<0xFF800000> : vector<24xf32>
    %104 = vector.multi_reduction <maximumf>, %103, %cst_62 [0] : vector<32x24xf32> to vector<24xf32>
    %105 = vector.shape_cast %104 : vector<24xf32> to vector<1x24xf32>
    %cst_63 = arith.constant -1.000000e+30 : f32
    %106 = vector.broadcast %cst_63 : f32 to vector<32x24xf32>
    %107 = arith.select %101, %45, %106 : vector<32x24xi1>, vector<32x24xf32>
    %cst_64 = arith.constant dense<0xFF800000> : vector<24xf32>
    %108 = vector.multi_reduction <maximumf>, %107, %cst_64 [0] : vector<32x24xf32> to vector<24xf32>
    %109 = vector.shape_cast %108 : vector<24xf32> to vector<1x24xf32>
    %110 = tpu.concatenate %105, %109 in 0 : vector<1x24xf32>, vector<1x24xf32> -> vector<2x24xf32>
    %c1_65 = arith.constant 1 : index
    %c0_66 = arith.constant 0 : index
    %c0_67 = arith.constant 0 : index
    %111 = vector.load %arg3[%c1_65, %c0_66, %c0_67] : memref<4x24x32xf32, #tpu.memory_space<vmem>>, vector<1x24x32xf32>
    %112 = vector.shape_cast %111 : vector<1x24x32xf32> to vector<24x32xf32>
    %cst_68 = arith.constant dense<0.000000e+00> : vector<2x32xf32>
    %113 = tpu.matmul %110, %112, %cst_68 {dimension_numbers = #tpu.dot_dimension_numbers<[1], [0], [0], [1], [0, 0, 1, 1], [], []>} : vector<2x24xf32>, vector<24x32xf32>, vector<2x32xf32> -> vector<2x32xf32>
    %114 = arith.addf %80, %113 : vector<2x32xf32>
    %c8_i32_69 = arith.constant 8 : i32
    %115 = vector.broadcast %c8_i32_69 : i32 to vector<32x24xi32>
    %116 = arith.cmpi slt, %47, %115 : vector<32x24xi32>
    %c16_i32_70 = arith.constant 16 : i32
    %117 = vector.broadcast %c16_i32_70 : i32 to vector<32x24xi32>
    %118 = arith.cmpi slt, %47, %117 : vector<32x24xi32>
    %c9_i32_71 = arith.constant 9 : i32
    %c11_i32 = arith.constant 11 : i32
    %119 = vector.broadcast %c9_i32_71 : i32 to vector<32x24xi32>
    %120 = vector.broadcast %c11_i32 : i32 to vector<32x24xi32>
    %121 = arith.select %118, %119, %120 : vector<32x24xi1>, vector<32x24xi32>
    %c8_i32_72 = arith.constant 8 : i32
    %122 = vector.broadcast %c8_i32_72 : i32 to vector<32x24xi32>
    %123 = arith.select %116, %122, %121 : vector<32x24xi1>, vector<32x24xi32>
    %c8_i32_73 = arith.constant 8 : i32
    %124 = vector.broadcast %c8_i32_73 : i32 to vector<32x24xi32>
    %125 = arith.cmpi slt, %47, %124 : vector<32x24xi32>
    %c16_i32_74 = arith.constant 16 : i32
    %126 = vector.broadcast %c16_i32_74 : i32 to vector<32x24xi32>
    %127 = arith.cmpi slt, %47, %126 : vector<32x24xi32>
    %c15_i32 = arith.constant 15 : i32
    %c18_i32 = arith.constant 18 : i32
    %128 = vector.broadcast %c15_i32 : i32 to vector<32x24xi32>
    %129 = vector.broadcast %c18_i32 : i32 to vector<32x24xi32>
    %130 = arith.select %127, %128, %129 : vector<32x24xi1>, vector<32x24xi32>
    %c13_i32 = arith.constant 13 : i32
    %131 = vector.broadcast %c13_i32 : i32 to vector<32x24xi32>
    %132 = arith.select %125, %131, %130 : vector<32x24xi1>, vector<32x24xi32>
    %133 = arith.cmpi sge, %46, %123 : vector<32x24xi32>
    %134 = arith.cmpi slt, %46, %132 : vector<32x24xi32>
    %135 = arith.andi %133, %134 : vector<32x24xi1>
    %cst_75 = arith.constant -1.000000e+30 : f32
    %136 = vector.broadcast %cst_75 : f32 to vector<32x24xf32>
    %137 = arith.select %135, %44, %136 : vector<32x24xi1>, vector<32x24xf32>
    %cst_76 = arith.constant dense<0xFF800000> : vector<24xf32>
    %138 = vector.multi_reduction <maximumf>, %137, %cst_76 [0] : vector<32x24xf32> to vector<24xf32>
    %139 = vector.shape_cast %138 : vector<24xf32> to vector<1x24xf32>
    %cst_77 = arith.constant -1.000000e+30 : f32
    %140 = vector.broadcast %cst_77 : f32 to vector<32x24xf32>
    %141 = arith.select %135, %45, %140 : vector<32x24xi1>, vector<32x24xf32>
    %cst_78 = arith.constant dense<0xFF800000> : vector<24xf32>
    %142 = vector.multi_reduction <maximumf>, %141, %cst_78 [0] : vector<32x24xf32> to vector<24xf32>
    %143 = vector.shape_cast %142 : vector<24xf32> to vector<1x24xf32>
    %144 = tpu.concatenate %139, %143 in 0 : vector<1x24xf32>, vector<1x24xf32> -> vector<2x24xf32>
    %c2_79 = arith.constant 2 : index
    %c0_80 = arith.constant 0 : index
    %c0_81 = arith.constant 0 : index
    %145 = vector.load %arg3[%c2_79, %c0_80, %c0_81] : memref<4x24x32xf32, #tpu.memory_space<vmem>>, vector<1x24x32xf32>
    %146 = vector.shape_cast %145 : vector<1x24x32xf32> to vector<24x32xf32>
    %cst_82 = arith.constant dense<0.000000e+00> : vector<2x32xf32>
    %147 = tpu.matmul %144, %146, %cst_82 {dimension_numbers = #tpu.dot_dimension_numbers<[1], [0], [0], [1], [0, 0, 1, 1], [], []>} : vector<2x24xf32>, vector<24x32xf32>, vector<2x32xf32> -> vector<2x32xf32>
    %148 = arith.addf %114, %147 : vector<2x32xf32>
    %c8_i32_83 = arith.constant 8 : i32
    %149 = vector.broadcast %c8_i32_83 : i32 to vector<32x24xi32>
    %150 = arith.cmpi slt, %47, %149 : vector<32x24xi32>
    %c16_i32_84 = arith.constant 16 : i32
    %151 = vector.broadcast %c16_i32_84 : i32 to vector<32x24xi32>
    %152 = arith.cmpi slt, %47, %151 : vector<32x24xi32>
    %c14_i32 = arith.constant 14 : i32
    %c17_i32 = arith.constant 17 : i32
    %153 = vector.broadcast %c14_i32 : i32 to vector<32x24xi32>
    %154 = vector.broadcast %c17_i32 : i32 to vector<32x24xi32>
    %155 = arith.select %152, %153, %154 : vector<32x24xi1>, vector<32x24xi32>
    %c12_i32_85 = arith.constant 12 : i32
    %156 = vector.broadcast %c12_i32_85 : i32 to vector<32x24xi32>
    %157 = arith.select %150, %156, %155 : vector<32x24xi1>, vector<32x24xi32>
    %c8_i32_86 = arith.constant 8 : i32
    %158 = vector.broadcast %c8_i32_86 : i32 to vector<32x24xi32>
    %159 = arith.cmpi slt, %47, %158 : vector<32x24xi32>
    %c16_i32_87 = arith.constant 16 : i32
    %160 = vector.broadcast %c16_i32_87 : i32 to vector<32x24xi32>
    %161 = arith.cmpi slt, %47, %160 : vector<32x24xi32>
    %c19_i32 = arith.constant 19 : i32
    %c23_i32 = arith.constant 23 : i32
    %162 = vector.broadcast %c19_i32 : i32 to vector<32x24xi32>
    %163 = vector.broadcast %c23_i32 : i32 to vector<32x24xi32>
    %164 = arith.select %161, %162, %163 : vector<32x24xi1>, vector<32x24xi32>
    %c17_i32_88 = arith.constant 17 : i32
    %165 = vector.broadcast %c17_i32_88 : i32 to vector<32x24xi32>
    %166 = arith.select %159, %165, %164 : vector<32x24xi1>, vector<32x24xi32>
    %167 = arith.cmpi sge, %46, %157 : vector<32x24xi32>
    %168 = arith.cmpi slt, %46, %166 : vector<32x24xi32>
    %169 = arith.andi %167, %168 : vector<32x24xi1>
    %cst_89 = arith.constant -1.000000e+30 : f32
    %170 = vector.broadcast %cst_89 : f32 to vector<32x24xf32>
    %171 = arith.select %169, %44, %170 : vector<32x24xi1>, vector<32x24xf32>
    %cst_90 = arith.constant dense<0xFF800000> : vector<24xf32>
    %172 = vector.multi_reduction <maximumf>, %171, %cst_90 [0] : vector<32x24xf32> to vector<24xf32>
    %173 = vector.shape_cast %172 : vector<24xf32> to vector<1x24xf32>
    %cst_91 = arith.constant -1.000000e+30 : f32
    %174 = vector.broadcast %cst_91 : f32 to vector<32x24xf32>
    %175 = arith.select %169, %45, %174 : vector<32x24xi1>, vector<32x24xf32>
    %cst_92 = arith.constant dense<0xFF800000> : vector<24xf32>
    %176 = vector.multi_reduction <maximumf>, %175, %cst_92 [0] : vector<32x24xf32> to vector<24xf32>
    %177 = vector.shape_cast %176 : vector<24xf32> to vector<1x24xf32>
    %178 = tpu.concatenate %173, %177 in 0 : vector<1x24xf32>, vector<1x24xf32> -> vector<2x24xf32>
    %c3_93 = arith.constant 3 : index
    %c0_94 = arith.constant 0 : index
    %c0_95 = arith.constant 0 : index
    %179 = vector.load %arg3[%c3_93, %c0_94, %c0_95] : memref<4x24x32xf32, #tpu.memory_space<vmem>>, vector<1x24x32xf32>
    %180 = vector.shape_cast %179 : vector<1x24x32xf32> to vector<24x32xf32>
    %cst_96 = arith.constant dense<0.000000e+00> : vector<2x32xf32>
    %181 = tpu.matmul %178, %180, %cst_96 {dimension_numbers = #tpu.dot_dimension_numbers<[1], [0], [0], [1], [0, 0, 1, 1], [], []>} : vector<2x24xf32>, vector<24x32xf32>, vector<2x32xf32> -> vector<2x32xf32>
    %182 = arith.addf %148, %181 : vector<2x32xf32>
    %c0_97 = arith.constant 0 : index
    %c0_98 = arith.constant 0 : index
    %183 = vector.load %arg4[%c0_97, %c0_98] : memref<1x32xf32, #tpu.memory_space<vmem>>, vector<1x32xf32>
    %184 = vector.broadcast %183 : vector<1x32xf32> to vector<2x32xf32>
    %185 = arith.addf %182, %184 : vector<2x32xf32>
    %cst_99 = arith.constant 0.000000e+00 : f32
    %186 = vector.broadcast %cst_99 : f32 to vector<2x32xf32>
    %187 = arith.maximumf %185, %186 : vector<2x32xf32>
    %c0_100 = arith.constant 0 : index
    %c0_101 = arith.constant 0 : index
    %188 = vector.load %arg5[%c0_100, %c0_101] : memref<32x128xf32, #tpu.memory_space<vmem>>, vector<32x128xf32>
    %cst_102 = arith.constant dense<0.000000e+00> : vector<2x128xf32>
    %189 = tpu.matmul %187, %188, %cst_102 {dimension_numbers = #tpu.dot_dimension_numbers<[1], [0], [0], [1], [0, 0, 1, 1], [], []>} : vector<2x32xf32>, vector<32x128xf32>, vector<2x128xf32> -> vector<2x128xf32>
    %c0_103 = arith.constant 0 : index
    %c0_104 = arith.constant 0 : index
    %190 = vector.load %arg6[%c0_103, %c0_104] : memref<1x128xf32, #tpu.memory_space<vmem>>, vector<1x128xf32>
    %191 = vector.broadcast %190 : vector<1x128xf32> to vector<2x128xf32>
    %192 = arith.addf %189, %191 : vector<2x128xf32>
    %c0_105 = arith.constant 0 : index
    %c0_106 = arith.constant 0 : index
    %193 = vector.load %arg7[%c0_105, %c0_106] : memref<2x128xf32, #tpu.memory_space<vmem>>, vector<2x128xf32>
    tpu.vector_store %arg7[%c0_105, %c0_106], %192 {strides = array<i32>} : memref<2x128xf32, #tpu.memory_space<vmem>>, vector<2x128xf32>,
    return
  }
}

</mosaic_0001>

<bundles_post_ra>
// kernel: tpu_custom_call.1
= control target key start
LH: loop header
LB: loop body
LE: loop exit
PB: predicated region body
PF: predicated region fallthrough
CT: control target
= control target key end

     0   :  { %vm52_vm0 = vcmask 261120   ;;  %s3090_s0 = inlined_call_operand.vmem [shape: f32[72,32], index: 0, kind: input, shape index: {}]   ;;  %s3091_s1 = inlined_call_operand.vmem [shape: f32[8,32,24], index: 1, kind: input, shape index: {}]   ;;  %s3092_s2 = inlined_call_operand.vmem [shape: f32[1,24], index: 2, kind: input, shape index: {}]   ;;  %s3093_s3 = inlined_call_operand.vmem [shape: f32[4,24,32], index: 3, kind: input, shape index: {}]   ;;  %s3094_s4 = inlined_call_operand.vmem [shape: f32[1,32], index: 4, kind: input, shape index: {}]   ;;  %s3095_s5 = inlined_call_operand.vmem [shape: f32[32,128], index: 5, kind: input, shape index: {}]   ;;  %s3096_s6 = inlined_call_operand.vmem [shape: f32[1,128], index: 6, kind: input, shape index: {}]   ;;  %s3097_s7 = inlined_call_operand.hbm [shape: f32[2,128], index: 7, kind: output, shape index: {}]  }
   0x1   :  { %v1864_v0 = vld [vmem:[%s3091_s1 + $0x20] sm:$0xff]  ;;  %v1865_v1 = vld [vmem:[%s3091_s1 + $0x28] sm:$0xff]  ;;  %v1866_v5 = vld [vmem:[%s3091_s1 + $0x30] sm:$0xff] }
   0x2   :  { %v1896_v2 = vld [vmem:[%s3091_s1 + $0x60] sm:$0xff]  ;;  %v2297_v3 = vpack.c.bf16 %v1865_v1, %v1864_v0  ;;  %v1897_v4 = vld [vmem:[%s3091_s1 + $0x68] sm:$0xff]  ;;  %v1867_v6 = vld [vmem:[%s3091_s1 + $0x38] sm:$0xff] }
   0x3   :  { %v2321_v7 = vpack.c.bf16 %v1897_v4, %v1896_v2  ;;  %v2301_v8 = vpack.c.bf16 %v1867_v6, %v1866_v5  ;;  %v1898_v9 = vld [vmem:[%s3091_s1 + $0x70] sm:$0xff]  ;;  %v1899_v10 = vld [vmem:[%s3091_s1 + $0x78] sm:$0xff]  ;;  %v39_v11 = vld [vmem:[%s3090_s0 + $0x1] sm:$0xff] }
   0x4   :  { %2298 = vmatprep.subr.bf16.mxu1 %v2297_v3  ;;  %v2325_v12 = vpack.c.bf16 %v1899_v10, %v1898_v9  ;;  %2098 = vmatprep.mubr.msk.f32.mxu1 %vm52_vm0, %v39_v11  ;;  %v461_v13 = vld [vmem:[%s3090_s0 + $0x3] sm:$0xff]  ;;  %v1910_v21 = vld [vmem:[%s3091_s1 + $0x90] sm:$0xff]  ;;  %v1911_v22 = vld [vmem:[%s3091_s1 + $0x98] sm:$0xff] }
   0x5   :  { %2322 = vmatprep.subr.bf16.mxu0 %v2321_v7  ;;  %2300 = vmatpush3.bf16.msra.mxu1 %v2297_v3  ;;  %v1908_v14 = vld [vmem:[%s3091_s1 + $0x80] sm:$0xff]  ;;  %v1909_v15 = vld [vmem:[%s3091_s1 + $0x88] sm:$0xff]  ;;  %v41_v24 = vld [vmem:[%s3090_s0 + $0x11] sm:$0xff]  ;;  %v2333_v27 = vpack.c.bf16 %v1911_v22, %v1910_v21 }
   0x6   :  { %2324 = vmatpush3.bf16.msra.mxu0 %v2321_v7  ;;  %2302 = vmatprep.subr.bf16.mxu1 %v2301_v8  ;;  %v2329_v16 = vpack.c.bf16 %v1909_v15, %v1908_v14  ;;  %v35_v17 = vld [vmem:[%s3091_s1] sm:$0xff]  ;;  %v36_v18 = vld [vmem:[%s3091_s1 + $0x8] sm:$0xff]  ;;  %v37_v25 = vld [vmem:[%s3091_s1 + $0x10] sm:$0xff] }
   0x7   :  { %2326 = vmatprep.subr.bf16.mxu0 %v2325_v12  ;;  %2158 = vmatprep.mubr.msk.f32.mxu0 %vm52_vm0, %v461_v13  ;;  %v40_v19 = vld [vmem:[%s3090_s0 + $0x9] sm:$0xff]  ;;  %v2305_v20 = vpack.c.bf16 %v36_v18, %v35_v17  ;;  %v463_v26 = vld [vmem:[%s3090_s0 + $0x13] sm:$0xff]  ;;  %v1920_v31 = vld [vmem:[%s3091_s1 + $0xa0] sm:$0xff] }
   0x8   :  { %v462_v23 = vld [vmem:[%s3090_s0 + $0xb] sm:$0xff]  ;;  %v38_v28 = vld [vmem:[%s3091_s1 + $0x18] sm:$0xff]  ;;  %v43_v34 = vld [vmem:[%s3090_s0 + $0x21] sm:$0xff] }
   0x9   :  { %2304 = vmatpush3.bf16.msra.mxu1 %v2301_v8  ;;  %v2309_v29 = vpack.c.bf16 %v38_v28, %v37_v25  ;;  %v42_v30 = vld [vmem:[%s3090_s0 + $0x19] sm:$0xff]  ;;  %v1921_v32 = vld [vmem:[%s3091_s1 + $0xa8] sm:$0xff]  ;;  %v45_v42 = vld [vmem:[%s3090_s0 + $0x31] sm:$0xff] }
   0xa   :  { %2328 = vmatpush3.bf16.msra.mxu0 %v2325_v12  ;;  %2306 = vmatprep.subr.bf16.mxu1 %v2305_v20  ;;  %v464_v33 = vld [vmem:[%s3090_s0 + $0x1b] sm:$0xff]  ;;  %v465_v35 = vld [vmem:[%s3090_s0 + $0x23] sm:$0xff]  ;;  %v2337_v36 = vpack.c.bf16 %v1921_v32, %v1920_v31  ;;  %v466_v41 = vld [vmem:[%s3090_s0 + $0x2b] sm:$0xff] }
   0xb   :  { %2330 = vmatprep.subr.bf16.mxu0 %v2329_v16  ;;  %v1884_v37 = vld [vmem:[%s3091_s1 + $0x40] sm:$0xff]  ;;  %v1885_v38 = vld [vmem:[%s3091_s1 + $0x48] sm:$0xff]  ;;  %v467_v43 = vld [vmem:[%s3090_s0 + $0x33] sm:$0xff] }
   0xc   :  { %2099 = vmatmul.mubr.msk.f32.vlgmr.msra.gmra.mrb[0].mxu1 %vm52_vm0, %v40_v19  ;;  %v44_v39 = vld [vmem:[%s3090_s0 + $0x29] sm:$0xff]  ;;  %v2313_v40 = vpack.c.bf16 %v1885_v38, %v1884_v37  ;;  %v46_v44 = vld [vmem:[%s3090_s0 + $0x39] sm:$0xff] }
   0xd   :  { %2159 = vmatmul.mubr.msk.f32.vlgmr.msra.gmra.mrb[0].mxu0 %vm52_vm0, %v462_v23  ;;  %2101 = vmatprep.mubr.msk.f32.mxu1 %vm52_vm0, %v41_v24  ;;  %v468_v45 = vld [vmem:[%s3090_s0 + $0x3b] sm:$0xff]  ;;  %v611_v47 = vld [vmem:[%s3090_s0 + $0x4] sm:$0xff]  ;;  %v1922_v48 = vld [vmem:[%s3091_s1 + $0xb0] sm:$0xff] }
   0xe   :  { %2332 = vmatpush3.bf16.msra.mxu0 %v2329_v16  ;;  %2161 = vmatprep.mubr.msk.f32.mxu0 %vm52_vm0, %v463_v26  ;;  %v27_v46 = vld [vmem:[%s3090_s0] sm:$0xff]  ;;  %v1923_v49 = vld [vmem:[%s3091_s1 + $0xb8] sm:$0xff]  ;;  %v28_v50 = vld [vmem:[%s3090_s0 + $0x8] sm:$0xff] }
   0xf   :  { %2334 = vmatprep.subr.bf16.mxu0 %v2333_v27  ;;  %2308 = vmatpush3.bf16.msra.mxu1 %v2305_v20  ;;  %v1886_v51 = vld [vmem:[%s3091_s1 + $0x50] sm:$0xff]  ;;  %v1887_v52 = vld [vmem:[%s3091_s1 + $0x58] sm:$0xff]  ;;  %v2341_v56 = vpack.c.bf16 %v1923_v49, %v1922_v48  ;;  %v1932_v58 = vld [vmem:[%s3091_s1 + $0xc0] sm:$0xff] }
  0x10   :  { %2102 = vmatmul.mubr.msk.f32.gmra.mrb[2].mxu1 %vm52_vm0, %v42_v30  ;;  %2310 = vmatprep.subr.bf16.mxu1 %v2309_v29  ;;  %v612_v53 = vld [vmem:[%s3090_s0 + $0xc] sm:$0xff]  ;;  %v613_v55 = vld [vmem:[%s3090_s0 + $0x14] sm:$0xff]  ;;  %v2317_v57 = vpack.c.bf16 %v1887_v52, %v1886_v51  ;;  %v614_v61 = vld [vmem:[%s3090_s0 + $0x1c] sm:$0xff] }
  0x11   :  { %2162 = vmatmul.mubr.msk.f32.gmra.mrb[2].mxu0 %vm52_vm0, %v464_v33  ;;  %2104 = vmatprep.mubr.msk.f32.mxu1 %vm52_vm0, %v43_v34  ;;  %v29_v54 = vld [vmem:[%s3090_s0 + $0x10] sm:$0xff]  ;;  %v1933_v59 = vld [vmem:[%s3091_s1 + $0xc8] sm:$0xff]  ;;  %v30_v60 = vld [vmem:[%s3090_s0 + $0x18] sm:$0xff] }
  0x12   :  { %2164 = vmatprep.mubr.msk.f32.mxu0 %vm52_vm0, %v465_v35  ;;  %2336 = vmatpush3.bf16.msra.mxu0 %v2333_v27  ;;  %v31_v62 = vld [vmem:[%s3090_s0 + $0x20] sm:$0xff]  ;;  %v2345_v0 = vpack.c.bf16 %v1933_v59, %v1932_v58  ;;  %v32_v1 = vld [vmem:[%s3090_s0 + $0x28] sm:$0xff] }
  0x13   :  { %2312 = vmatpush3.bf16.msra.mxu1 %v2309_v29  ;;  %2338 = vmatprep.subr.bf16.mxu0 %v2337_v36  ;;  %v615_v63 = vld [vmem:[%s3090_s0 + $0x24] sm:$0xff] }
  0x14   :  { %2105 = vmatmul.mubr.msk.f32.gmra.mrb[4].mxu1 %vm52_vm0, %v44_v39  ;;  %2314 = vmatprep.subr.bf16.mxu1 %v2313_v40 }
  0x15   :  { %2165 = vmatmul.mubr.msk.f32.gmra.mrb[4].mxu0 %vm52_vm0, %v466_v41  ;;  %2107 = vmatprep.mubr.msk.f32.mxu1 %vm52_vm0, %v45_v42 }
  0x16   :  { %2167 = vmatprep.mubr.msk.f32.mxu0 %vm52_vm0, %v467_v43 }
  0x18   :  { %2108 = vmatmul.mubr.msk.f32.gmra.mrb[6].mxu1 %vm52_vm0, %v46_v44 }
  0x19   :  { %2168 = vmatmul.mubr.msk.f32.gmra.mrb[6].mxu0 %vm52_vm0, %v468_v45  ;;  %2118 = vmatprep.mubr.msk.f32.mxu1 %vm52_vm0, %v27_v46 }
  0x1a   :  { %2178 = vmatprep.mubr.msk.f32.mxu0 %vm52_vm0, %v611_v47 }
  0x1c   :  { %2119 = vmatmul.mubr.msk.f32.vlgmr.msra.gmra.mrb[0].mxu1 %vm52_vm0, %v28_v50 }
  0x1d   :  { %2179 = vmatmul.mubr.msk.f32.vlgmr.msra.gmra.mrb[0].mxu0 %vm52_vm0, %v612_v53  ;;  %2121 = vmatprep.mubr.msk.f32.mxu1 %vm52_vm0, %v29_v54 }
  0x1e   :  { %2340 = vmatpush3.bf16.msra.mxu0 %v2337_v36  ;;  %2181 = vmatprep.mubr.msk.f32.mxu0 %vm52_vm0, %v613_v55 }
  0x1f   :  { %2342 = vmatprep.subr.bf16.mxu0 %v2341_v56  ;;  %2316 = vmatpush3.bf16.msra.mxu1 %v2313_v40 }
  0x20   :  { %2122 = vmatmul.mubr.msk.f32.gmra.mrb[8].mxu1 %vm52_vm0, %v30_v60  ;;  %2318 = vmatprep.subr.bf16.mxu1 %v2317_v57 }
  0x21   :  { %2182 = vmatmul.mubr.msk.f32.gmra.mrb[8].mxu0 %vm52_vm0, %v614_v61  ;;  %2124 = vmatprep.mubr.msk.f32.mxu1 %vm52_vm0, %v31_v62 }
  0x22   :  { %12 = vsyncpa [#allocation3], 0  ;;  %2184 = vmatprep.mubr.msk.f32.mxu0 %vm52_vm0, %v615_v63  ;;  %v616_v2 = vld [vmem:[%s3090_s0 + $0x2c] sm:$0xff]  ;;  %2344 = vmatpush3.bf16.msra.mxu0 %v2341_v56  ;;  %v617_v4 = vld [vmem:[%s3090_s0 + $0x34] sm:$0xff]  ;;  %v2443_v51 = vmov 0.0|0.0   ;;  %v2444_v53 = vmov 0.0  }
  0x23   :  { %v33_v3 = vld [vmem:[%s3090_s0 + $0x30] sm:$0xff]  ;;  %2320 = vmatpush3.bf16.msra.mxu1 %v2317_v57  ;;  %2346 = vmatprep.subr.bf16.mxu0 %v2345_v0  ;;  %v34_v5 = vld [vmem:[%s3090_s0 + $0x38] sm:$0xff]  ;;  %v311_v7 = vld [vmem:[%s3090_s0 + $0x2] sm:$0xff]  ;;  %vm2445_vm1 = vmmov 0   ;;  %vm1261_vm6 = vcmask 195584   ;;  %s2454_s15 = smov [#allocation2]  }
  0x24   :  { %2125 = vmatmul.mubr.msk.f32.gmra.mrb[4].mxu1 %vm52_vm0, %v32_v1  ;;  %v618_v6 = vld [vmem:[%s3090_s0 + $0x3c] sm:$0xff]  ;;  %v761_v8 = vld [vmem:[%s3090_s0 + $0x5] sm:$0xff]  ;;  %v1934_v9 = vld [vmem:[%s3091_s1 + $0xd0] sm:$0xff]  ;;  %2361 = vmatprep.subr.bf16.mxu1 %v2443_v51  ;;  %s1856_s16 = sshll.u32 %s2454_s15, 4  ;;  %s1857_s16 = int_to_ptr.vmem [resolvable:$true] %s1856_s16 }
  0x25   :  { %2185 = vmatmul.mubr.msk.f32.gmra.mrb[4].mxu0 %vm52_vm0, %v616_v2  ;;  %2127 = vmatprep.mubr.msk.f32.mxu1 %vm52_vm0, %v33_v3  ;;  %v1935_v10 = vld [vmem:[%s3091_s1 + $0xd8] sm:$0xff]  ;;  %v312_v11 = vld [vmem:[%s3090_s0 + $0xa] sm:$0xff]  ;;  %v1944_v16 = vld [vmem:[%s3091_s1 + $0xe0] sm:$0xff]  ;;  %s2419_s17 = scalar_lea.vmem %s1857_s16, 32  ;;  %p2424_p1 = scmp.lt.s32.totalorder %s1857_s16, %s1857_s16 }
  0x26   :  { %2187 = vmatprep.mubr.msk.f32.mxu0 %vm52_vm0, %v617_v4  ;;  %v762_v12 = vld [vmem:[%s3090_s0 + $0xd] sm:$0xff]  ;;  %v763_v14 = vld [vmem:[%s3090_s0 + $0x15] sm:$0xff]  ;;  %v2349_v15 = vpack.c.bf16 %v1935_v10, %v1934_v9  ;;  %v764_v19 = vld [vmem:[%s3090_s0 + $0x1d] sm:$0xff]  ;;  %p2420_p0 = scmp.ne.s32.totalorder %s1857_s16, %s2419_s17  ;;  %p2425_p2 = scmp.lt.s32.totalorder %s2419_s17, %s2419_s17 }
  0x27   :  { %v313_v13 = vld [vmem:[%s3090_s0 + $0x12] sm:$0xff]  ;;  %v1945_v17 = vld [vmem:[%s3091_s1 + $0xe8] sm:$0xff]  ;;  %v314_v18 = vld [vmem:[%s3090_s0 + $0x1a] sm:$0xff] }
  0x28   :  { %2128 = vmatmul.mubr.msk.f32.gmra.mrb[10].mxu1 %vm52_vm0, %v34_v5  ;;  %v315_v20 = vld [vmem:[%s3090_s0 + $0x22] sm:$0xff]  ;;  %v2353_v22 = vpack.c.bf16 %v1945_v17, %v1944_v16  ;;  %v316_v23 = vld [vmem:[%s3090_s0 + $0x2a] sm:$0xff]  ;;  %v317_v25 = vld [vmem:[%s3090_s0 + $0x32] sm:$0xff]  ;;  %p2426_p3 = por %p2425_p2, %p2424_p1 }
  0x29   :  { %2188 = vmatmul.mubr.msk.f32.gmra.mrb[10].mxu0 %vm52_vm0, %v618_v6  ;;  %2138 = vmatprep.mubr.msk.f32.mxu1 %vm52_vm0, %v311_v7  ;;  %v765_v21 = vld [vmem:[%s3090_s0 + $0x25] sm:$0xff]  ;;  %v766_v24 = vld [vmem:[%s3090_s0 + $0x2d] sm:$0xff]  ;;  %v767_v26 = vld [vmem:[%s3090_s0 + $0x35] sm:$0xff] }
  0x2a   :  { %2198 = vmatprep.mubr.msk.f32.mxu0 %vm52_vm0, %v761_v8  ;;  %v318_v27 = vld [vmem:[%s3090_s0 + $0x3a] sm:$0xff]  ;;  %v911_v29 = vld [vmem:[%s3090_s0 + $0x6] sm:$0xff]  ;;  %v1946_v30 = vld [vmem:[%s3091_s1 + $0xf0] sm:$0xff]  ;;  %p2427_p4 = pnand %p2426_p3, %p2420_p0 }
  0x2b   :  { %v768_v28 = vld [vmem:[%s3090_s0 + $0x3d] sm:$0xff]  ;;  %v912_v32 = vld [vmem:[%s3090_s0 + $0xe] sm:$0xff]  ;;  %v915_v36 = vld [vmem:[%s3090_s0 + $0x26] sm:$0xff] }
  0x2c   :  { %2139 = vmatmul.mubr.msk.f32.vlgmr.msra.gmra.mrb[0].mxu1 %vm52_vm0, %v312_v11  ;;  %v1947_v31 = vld [vmem:[%s3091_s1 + $0xf8] sm:$0xff]  ;;  %v916_v37 = vld [vmem:[%s3090_s0 + $0x2e] sm:$0xff]  ;;  %v1958_v49 = vld [vmem:[%s3093_s3 + $0x20] sm:$0xff] }
  0x2d   :  { %2199 = vmatmul.mubr.msk.f32.vlgmr.msra.gmra.mrb[0].mxu0 %vm52_vm0, %v762_v12  ;;  %2141 = vmatprep.mubr.msk.f32.mxu1 %vm52_vm0, %v313_v13  ;;  %v913_v33 = vld [vmem:[%s3090_s0 + $0x16] sm:$0xff]  ;;  %v2357_v34 = vpack.c.bf16 %v1947_v31, %v1946_v30  ;;  %v914_v35 = vld [vmem:[%s3090_s0 + $0x1e] sm:$0xff]  ;;  %v1061_v40 = vld [vmem:[%s3090_s0 + $0x7] sm:$0xff] }
  0x2e   :  { %2348 = vmatpush3.bf16.msra.mxu0 %v2345_v0  ;;  %2201 = vmatprep.mubr.msk.f32.mxu0 %vm52_vm0, %v763_v14  ;;  %v917_v38 = vld [vmem:[%s3090_s0 + $0x36] sm:$0xff]  ;;  %v918_v39 = vld [vmem:[%s3090_s0 + $0x3e] sm:$0xff]  ;;  %v1065_v44 = vld [vmem:[%s3090_s0 + $0x27] sm:$0xff] }
  0x2f   :  { %2350 = vmatprep.subr.bf16.mxu0 %v2349_v15  ;;  %v1062_v41 = vld [vmem:[%s3090_s0 + $0xf] sm:$0xff]  ;;  %v1063_v42 = vld [vmem:[%s3090_s0 + $0x17] sm:$0xff]  ;;  %v1064_v43 = vld [vmem:[%s3090_s0 + $0x1f] sm:$0xff] }
  0x30   :  { %2142 = vmatmul.mubr.msk.f32.gmra.mrb[12].mxu1 %vm52_vm0, %v314_v18  ;;  %v1066_v45 = vld [vmem:[%s3090_s0 + $0x2f] sm:$0xff]  ;;  %v1067_v46 = vld [vmem:[%s3090_s0 + $0x37] sm:$0xff]  ;;  %v1068_v47 = vld [vmem:[%s3090_s0 + $0x3f] sm:$0xff] }
  0x31   :  { %2202 = vmatmul.mubr.msk.f32.gmra.mrb[12].mxu0 %vm52_vm0, %v764_v19  ;;  %2144 = vmatprep.mubr.msk.f32.mxu1 %vm52_vm0, %v315_v20  ;;  %v1957_v48 = vld [vmem:[%s3093_s3 + $0x18] sm:$0xff]  ;;  %v1959_v52 = vld [vmem:[%s3093_s3 + $0x28] sm:$0xff] }
  0x32   :  { %2204 = vmatprep.mubr.msk.f32.mxu0 %vm52_vm0, %v765_v21  ;;  %2352 = vmatpush3.bf16.msra.mxu0 %v2349_v15  ;;  %v2362_v50 = vpack.c.bf16 %v1958_v49, %v1957_v48  ;;  %v2450_v48 = vmov 6  }
  0x33   :  { %2354 = vmatprep.subr.bf16.mxu0 %v2353_v22 }
  0x34   :  { %2145 = vmatmul.mubr.msk.f32.gmra.mrb[4].mxu1 %vm52_vm0, %v316_v23 }
  0x35   :  { %2205 = vmatmul.mubr.msk.f32.gmra.mrb[4].mxu0 %vm52_vm0, %v766_v24  ;;  %2147 = vmatprep.mubr.msk.f32.mxu1 %vm52_vm0, %v317_v25 }
  0x36   :  { %2207 = vmatprep.mubr.msk.f32.mxu0 %vm52_vm0, %v767_v26  ;;  %2363 = vmatpush3.bf16.msra.mxu1 %v2362_v50  ;;  %v1234_v26 = vlaneseq  ;;  %v2451_v50 = vmov 5  }
  0x37   :  { %2254 = vmatprep.subr.mxu1 %v2444_v53 }
  0x38   :  { %2148 = vmatmul.mubr.msk.f32.gmra.mrb[14].mxu1 %vm52_vm0, %v318_v27  ;;  %v1240_v30 = vand.u32 127, %v1234_v26 }
  0x39   :  { %2208 = vmatmul.mubr.msk.f32.gmra.mrb[14].mxu0 %vm52_vm0, %v768_v28  ;;  %2256 = vmatprep.mubr.msk.f32.mxu1 %vm2445_vm1, %v2444_v53 }
  0x3a   :  { %2218 = vmatprep.mubr.msk.f32.mxu0 %vm52_vm0, %v911_v29  ;;  %2255 = vmatpush3.msra.mxu1 %v1959_v52  ;;  %vm1242_vm2 = vcmp.lt.s32.totalorder %v1240_v30, 16  ;;  %vm1241_vm3 = vcmp.lt.s32.totalorder %v1240_v30, 8 }
  0x3b   :  { %2364 = vmatprep.subr.bf16.mxu1 %v2443_v51  ;;  %v1243_v49 = vsel %vm1242_vm2, 5, %v2450_v48  ;;  %v1297_v52 = vsel %vm1242_vm2, 4, %v2451_v50 }
  0x3d   :  { %2219 = vmatmul.mubr.msk.f32.vlgmr.msra.gmra.mrb[0].mxu0 %vm52_vm0, %v912_v32 }
  0x3e   :  { %2356 = vmatpush3.bf16.msra.mxu0 %v2353_v22  ;;  %2221 = vmatprep.mubr.msk.f32.mxu0 %vm52_vm0, %v913_v33  ;;  %v2865_v33 = vshrl.u32 %v1234_v26, 7 }
  0x3f   :  { %2358 = vmatprep.subr.bf16.mxu0 %v2357_v34 }
  0x41   :  { %2222 = vmatmul.mubr.msk.f32.gmra.mrb[16].mxu0 %vm52_vm0, %v914_v35 }
  0x42   :  { %2224 = vmatprep.mubr.msk.f32.mxu0 %vm52_vm0, %v915_v36  ;;  %2360 = vmatpush3.bf16.msra.mxu0 %v2357_v34  ;;  %v2446_v34 = vmov 11   ;;  %v2447_v36 = vmov 18  }
  0x43   :  { %v1498_v35 = vsel %vm1242_vm2, 9, %v2446_v34 }
  0x45   :  { %2225 = vmatmul.mubr.msk.f32.gmra.mrb[4].mxu0 %vm52_vm0, %v916_v37  ;;  %v1500_v37 = vsel %vm1242_vm2, 15, %v2447_v36 }
  0x46   :  { %2227 = vmatprep.mubr.msk.f32.mxu0 %vm52_vm0, %v917_v38 }
  0x49   :  { %2228 = vmatmul.mubr.msk.f32.gmra.mrb[18].mxu0 %vm52_vm0, %v918_v39 }
  0x4a   :  { %2238 = vmatprep.mubr.msk.f32.mxu0 %vm52_vm0, %v1061_v40  ;;  %v2870_v40 = vadd.s32 8, %v2865_v33 }
  0x4d   :  { %2239 = vmatmul.mubr.msk.f32.vlgmr.msra.gmra.mrb[0].mxu0 %vm52_vm0, %v1062_v41  ;;  %v2448_v41 = vmov 12  }
  0x4e   :  { %2241 = vmatprep.mubr.msk.f32.mxu0 %vm52_vm0, %v1063_v42  ;;  %v1299_v42 = vsel %vm1242_vm2, 10, %v2448_v41 }
  0x51   :  { %2242 = vmatmul.mubr.msk.f32.gmra.mrb[20].mxu0 %vm52_vm0, %v1064_v43  ;;  %v2449_v43 = vmov 17  }
  0x52   :  { %2244 = vmatprep.mubr.msk.f32.mxu0 %vm52_vm0, %v1065_v44  ;;  %v1627_v44 = vsel %vm1242_vm2, 14, %v2449_v43 }
  0x55   :  { %2245 = vmatmul.mubr.msk.f32.gmra.mrb[4].mxu0 %vm52_vm0, %v1066_v45 }
  0x56   :  { %2247 = vmatprep.mubr.msk.f32.mxu0 %vm52_vm0, %v1067_v46  ;;  %v1499_v46 = vsel %vm1241_vm3, 8, %v1498_v35 }
  0x57   :  { %vm1503_vm4 = vcmp.ge.s32.totalorder %v2870_v40, %v1499_v46 }
  0x59   :  { %2248 = vmatmul.mubr.msk.f32.gmra.mrb[22].mxu0 %vm52_vm0, %v1068_v47  ;;  %v2878_v47 = vsel %vm1241_vm3, 13, %v1500_v37 }
  0x5a   :  { %vm1507_vm5 = vcmp.lt.s32.totalorder %v2870_v40, %v2878_v47 }
  0x5b   :  { %vm2912_vm9 = vmand %vm1503_vm4, %vm1507_vm5 }
  0xe3   :  { %v2103_v54 = vpop.f32.mrb[2].mxu1 }
  0xe4   :  { %v2163_v55 = vpop.f32.mrb[2].mxu0  ;;  %v153_v56 = vpop.f32.mrb[3].mxu1 }
  0xe5   :  { %v574_v57 = vpop.f32.mrb[3].mxu0  ;;  %v2885_v55 = vld [vmem:[%s3092_s2] ss:$0 sm:$0xff] }
  0xeb   :  { %v2109_v58 = vpop.f32.mrb[6].mxu1 }
  0xec   :  { %v2169_v59 = vpop.f32.mrb[6].mxu0  ;;  %v173_v60 = vpop.f32.mrb[7].mxu1 }
  0xed   :  { %v594_v61 = vpop.f32.mrb[7].mxu0 }
  0xf3   :  { %v2123_v62 = vpop.f32.mrb[8].mxu1 }
  0xf4   :  { %v2183_v63 = vpop.f32.mrb[8].mxu0  ;;  %v282_v0 = vpop.f32.mrb[9].mxu1 }
  0xf5   :  { %v724_v1 = vpop.f32.mrb[9].mxu0  ;;  %v283_v2 = vadd.f32 %v282_v0, %v153_v56  ;;  %v2888_v56 = vsel %vm1241_vm3, 9, %v1299_v42  ;;  %v2898_v63 = vsel %vm1241_vm3, 5, %v1243_v49  ;;  %v2901_v0 = vsel %vm1241_vm3, 4, %v1297_v52 }
  0xf6   :  { %vm1306_vm7 = vcmp.lt.s32.totalorder %v2870_v40, %v2888_v56  ;;  %vm1249_vm10 = vcmp.lt.s32.totalorder %v2865_v33, %v2898_v63  ;;  %vm1301_vm11 = vcmp.ge.s32.totalorder %v2865_v33, %v2901_v0 }
  0xfb   :  { %v2129_v3 = vpop.f32.mrb[10].mxu1 }
  0xfc   :  { %v2189_v4 = vpop.f32.mrb[10].mxu0  ;;  %v302_v5 = vpop.f32.mrb[11].mxu1 }
  0xfd   :  { %v744_v6 = vpop.f32.mrb[11].mxu0  ;;  %v303_v7 = vadd.f32 %v302_v5, %v173_v60  ;;  %v2452_v60 = vmov 23  }
  0xff   :  { %v2140_v8 = vpop.f32.mrb[0].mxu1 }
 0x100   :  { %v414_v9 = vpop.f32.mrb[1].mxu1 }
 0x103   :  { %v2143_v10 = vpop.f32.mrb[12].mxu1 }
 0x104   :  { %v2203_v11 = vpop.f32.mrb[12].mxu0  ;;  %v424_v12 = vpop.f32.mrb[13].mxu1 }
 0x105   :  { %v455_v13 = vadd.f32 %v424_v12, %v283_v2  ;;  %v874_v14 = vpop.f32.mrb[13].mxu0 }
 0x107   :  { %v605_v15 = vadd.f32 %v574_v57, %v455_v13  ;;  %v2861_v16 = vpop.f32.mrb[4].mxu1  ;;  %v2891_v57 = vsel %vm1241_vm3, 12, %v1627_v44 }
 0x108   :  { %v2863_v17 = vpop.f32.mrb[5].mxu1  ;;  %vm1632_vm8 = vcmp.ge.s32.totalorder %v2870_v40, %v2891_v57 }
 0x109   :  { %v755_v18 = vadd.f32 %v724_v1, %v605_v15  ;;  %v2904_v1 = vadd.s32 16, %v2865_v33 }
 0x10b   :  { %v905_v19 = vadd.f32 %v874_v14, %v755_v18  ;;  %v2149_v20 = vpop.f32.mrb[14].mxu1  ;;  %vm1633_vm12 = vcmp.ge.s32.totalorder %v2904_v1, %v2891_v57  ;;  %vm1508_vm14 = vcmp.lt.s32.totalorder %v2904_v1, %v2878_v47 }
 0x10c   :  { %v2209_v21 = vpop.f32.mrb[14].mxu0  ;;  %v444_v22 = vpop.f32.mrb[15].mxu1 }
 0x10d   :  { %v459_v23 = vadd.f32 %v444_v22, %v303_v7  ;;  %v894_v24 = vpop.f32.mrb[15].mxu0 }
 0x10f   :  { %v609_v25 = vadd.f32 %v594_v61, %v459_v23  ;;  %v1629_v61 = vsel %vm1242_vm2, 19, %v2452_v60  ;;  %vm1292_vm2 = vcmask 1040384  }
 0x111   :  { %v759_v27 = vadd.f32 %v744_v6, %v609_v25  ;;  %v1630_v6 = vsel %vm1241_vm3, 17, %v1629_v61 }
 0x112   :  { %vm1637_vm13 = vcmp.lt.s32.totalorder %v2904_v1, %v1630_v6 }
 0x113   :  { %v909_v28 = vadd.f32 %v894_v24, %v759_v27  ;;  %vm2951_vm15 = vmand %vm1633_vm12, %vm1637_vm13 }
 0x114   :  { %v2223_v29 = vpop.f32.mrb[16].mxu0 }
 0x115   :  { %v1024_v31 = vpop.f32.mrb[17].mxu0 }
 0x116   :  { %v1055_v32 = vadd.f32 %v1024_v31, %v905_v19 }
 0x11c   :  { %v2229_v38 = vpop.f32.mrb[18].mxu0 }
 0x11d   :  { %v1044_v39 = vpop.f32.mrb[19].mxu0 }
 0x11e   :  { %v2874_v45 = vadd.f32 %v1044_v39, %v909_v28 }
 0x120   :  { %v2240_v54 = vpop.f32.mrb[0].mxu0 }
 0x121   :  { %v2379_v58 = vadd.f32 %v2240_v54, %v2140_v8  ;;  %v1164_v59 = vpop.f32.mrb[1].mxu0 }
 0x122   :  { %v2380_v62 = vadd.f32 %v1164_v59, %v414_v9  ;;  %v2453_v9 = vmov -inf  }
 0x123   :  { %v1219_v2 = vadd.f32 %v2379_v58, %v2885_v55  ;;  %v2922_v10 = vsel %vm1261_vm6, -1e+30, %v2453_v9 }
 0x124   :  { %v1218_v3 = vadd.f32 %v2380_v62, %v2885_v55  ;;  %v2243_v4 = vpop.f32.mrb[20].mxu0 }
 0x125   :  { %v1227_v7 = vmax.f32 %v1219_v2, 0.0  ;;  %v1174_v8 = vpop.f32.mrb[21].mxu0 }
 0x126   :  { %v1226_v11 = vmax.f32 %v1218_v3, 0.0  ;;  %v1205_v12 = vadd.f32 %v1174_v8, %v1055_v32 }
 0x127   :  { %v1314_v13 = vsel %vm1306_vm7, %v1227_v7, -1e+30  ;;  %v1644_v14 = vsel %vm1632_vm8, %v1227_v7, -1e+30  ;;  %v1515_v15 = vsel %vm2912_vm9, %v1227_v7, -1e+30 }
 0x128   :  { %v1257_v18 = vsel %vm1249_vm10, %v1226_v11, -1e+30  ;;  %v1313_v19 = vsel %vm1301_vm11, %v1226_v11, -1e+30  ;;  %v1318_v20 = vsel %vm1261_vm6, %v1314_v13, -inf  ;;  %v1220_v23 = vadd.f32 %v2885_v55, %v1205_v12  ;;  %v2246_v24 = vpop.f32.mrb[4].mxu0 }
 0x129   :  { %v1262_v21 = vsel %vm1261_vm6, %v1257_v18, -inf  ;;  %v1317_v22 = vsel %vm1261_vm6, %v1313_v19, -inf  ;;  %v2381_v28 = vadd.f32 %v2246_v24, %v2861_v16  ;;  %v1184_v29 = vpop.f32.mrb[5].mxu0  ;;  %v1648_v30 = vsel %vm1261_vm6, %v1644_v14, -inf }
 0x12a   :  { %v1266_v25 = vmax.f32 %v1262_v21, %v2922_v10  ;;  %v1321_v26 = vmax.f32 %v1317_v22, %v1318_v20  ;;  %v1228_v31 = vmax.f32 %v1220_v23, 0.0  ;;  %v1519_v32 = vsel %vm1261_vm6, %v1515_v15, -inf }
 0x12b   :  { %v2382_v34 = vadd.f32 %v1184_v29, %v2863_v17  ;;  %v1223_v37 = vadd.f32 %v2381_v28, %v2885_v55  ;;  %v1651_v43 = vmax.f32 %v2922_v10, %v1648_v30  ;;  %v1522_v44 = vmax.f32 %v2922_v10, %v1519_v32 }
 0x12c   :  { %v1268_v35 = vmax.f32 %v1266_v25, %v2922_v10  ;;  %v1323_v36 = vmax.f32 %v1321_v26, %v2922_v10  ;;  %v2249_v38 = vpop.f32.mrb[22].mxu0  ;;  %v1516_v39 = vsel %vm1508_vm14, %v1228_v31, -1e+30  ;;  %v1645_v16 = vsel %vm2951_vm15, %v1228_v31, -1e+30 }
 0x12d   :  { %v1222_v41 = vadd.f32 %v2382_v34, %v2885_v55  ;;  %v1194_v42 = vpop.f32.mrb[23].mxu0  ;;  %v1520_v17 = vsel %vm1261_vm6, %v1516_v39, -inf  ;;  %v1649_v46 = vsel %vm1261_vm6, %v1645_v16, -inf  ;;  %v1231_v52 = vmax.f32 %v1223_v37, 0.0 }
 0x12e   :  { %v1269_v48 = vrot.slane %v1268_v35, 4  ;;  %v1523_v49 = vmax.f32 %v1520_v17, %v2922_v10  ;;  %v1652_v50 = vmax.f32 %v1649_v46, %v2922_v10  ;;  %v1324_v54 = vrot.slane %v1323_v36, 4 }
 0x12f   :  { %v1230_v58 = vmax.f32 %v1222_v41, 0.0  ;;  %v1209_v59 = vadd.f32 %v1194_v42, %v2874_v45  ;;  %v1532_v62 = vsel %vm2912_vm9, %v1231_v52, -1e+30  ;;  %v1331_v3 = vsel %vm1306_vm7, %v1231_v52, -1e+30 }
 0x130   :  { %v1524_v60 = vmax.f32 %v1522_v44, %v1523_v49  ;;  %v1653_v61 = vmax.f32 %v1651_v43, %v1652_v50  ;;  %v1270_v2 = vmax.f32 %v1268_v35, %v1269_v48  ;;  %v1325_v4 = vmax.f32 %v1323_v36, %v1324_v54  ;;  %v1295_v49 = vld [vmem:[%s3093_s3 + $0x8] sm:$0xff] }
 0x131   :  { %v1536_v6 = vsel %vm1261_vm6, %v1532_v62, -inf  ;;  %v1275_v7 = vsel %vm1249_vm10, %v1230_v58, -1e+30  ;;  %v1330_v45 = vsel %vm1301_vm11, %v1230_v58, -1e+30  ;;  %v1335_v13 = vsel %vm1261_vm6, %v1331_v3, -inf }
 0x132   :  { %v1525_v8 = vrot.slane %v1524_v60, 4  ;;  %v1661_v5 = vsel %vm1632_vm8, %v1231_v52, -1e+30  ;;  %v1279_v9 = vsel %vm1261_vm6, %v1275_v7, -inf  ;;  %v1334_v56 = vsel %vm1261_vm6, %v1330_v45, -inf }
 0x133   :  { %v1654_v11 = vrot.slane %v1653_v61, 4  ;;  %v1283_v12 = vmax.f32 %v1279_v9, %v2922_v10  ;;  %v1224_v63 = vadd.f32 %v2885_v55, %v1209_v59  ;;  %v1338_v14 = vmax.f32 %v1334_v56, %v1335_v13  ;;  %v1962_v9 = vld [vmem:[%s3093_s3 + $0x30] sm:$0xff]  ;;  %v1963_v56 = vld [vmem:[%s3093_s3 + $0x38] sm:$0xff] }
 0x134   :  { %v1271_v15 = vrot.slane %v1270_v2, 2  ;;  %v1665_v33 = vsel %vm1261_vm6, %v1661_v5, -inf  ;;  %v1326_v40 = vrot.slane %v1325_v4, 2  ;;  %v1526_v57 = vmax.f32 %v1524_v60, %v1525_v8  ;;  %v1296_v13 = vld [vmem:[%s3093_s3 + $0x10] sm:$0xff] }
 0x135   :  { %v1285_v0 = vmax.f32 %v1283_v12, %v2922_v10  ;;  %v1232_v18 = vmax.f32 %v1224_v63, 0.0  ;;  %v1539_v19 = vmax.f32 %v2922_v10, %v1536_v6  ;;  %v1340_v20 = vmax.f32 %v1338_v14, %v2922_v10 }
 0x136   :  { %v1655_v21 = vmax.f32 %v1653_v61, %v1654_v11  ;;  %v1668_v24 = vmax.f32 %v2922_v10, %v1665_v33  ;;  %v1272_v32 = vmax.f32 %v1270_v2, %v1271_v15  ;;  %v1327_v34 = vmax.f32 %v1325_v4, %v1326_v40 }
 0x137   :  { %v1286_v22 = vrot.slane %v1285_v0, 4  ;;  %v1533_v23 = vsel %vm1508_vm14, %v1232_v18, -1e+30  ;;  %v1662_v55 = vsel %vm2951_vm15, %v1232_v18, -1e+30  ;;  %v1341_v25 = vrot.slane %v1340_v20, 4 }
 0x138   :  { %v1537_v26 = vsel %vm1261_vm6, %v1533_v23, -inf  ;;  %v1666_v28 = vsel %vm1261_vm6, %v1662_v55, -inf  ;;  %v1527_v35 = vrot.slane %v1526_v57, 2  ;;  %v1656_v1 = vrot.slane %v1655_v21, 2  ;;  %v1765_v23 = vld [vmem:[%s3095_s5] sm:$0xff]  ;;  %v1766_v55 = vld [vmem:[%s3095_s5 + $0x8] sm:$0xff] }
 0x139   :  { %v1287_v29 = vmax.f32 %v1285_v0, %v1286_v22  ;;  %v1540_v30 = vmax.f32 %v1537_v26, %v2922_v10  ;;  %v1669_v31 = vmax.f32 %v1666_v28, %v2922_v10  ;;  %v1342_v47 = vmax.f32 %v1340_v20, %v1341_v25  ;;  %v1294_v10 = vld [vmem:[%s3093_s3] sm:$0xff]  ;;  %v1968_v22 = vld [vmem:[%s3093_s3 + $0x58] sm:$0xff]  ;;  %v1767_v25 = vld [vmem:[%s3095_s5 + $0x10] sm:$0xff] }
 0x13a   :  { %v1273_v41 = vrot.slane %v1272_v32, 1  ;;  %v1328_v17 = vrot.slane %v1327_v34, 1  ;;  %v1528_v44 = vmax.f32 %v1526_v57, %v1527_v35  ;;  %v1657_v52 = vmax.f32 %v1655_v21, %v1656_v1  ;;  %v1966_v57 = vld [vmem:[%s3093_s3 + $0x48] sm:$0xff]  ;;  %v1964_v20 = vld [vmem:[%s3093_s3 + $0x40] sm:$0xff] }
 0x13b   :  { %v1288_v36 = vrot.slane %v1287_v29, 2  ;;  %v1541_v27 = vmax.f32 %v1539_v19, %v1540_v30  ;;  %v1670_v37 = vmax.f32 %v1668_v24, %v1669_v31  ;;  %v1343_v38 = vrot.slane %v1342_v47, 2  ;;  %v1967_v19 = vld [vmem:[%s3093_s3 + $0x50] sm:$0xff] }
 0x13c   :  { %v1274_v60 = vmax.f32 %v1272_v32, %v1273_v41  ;;  %v1329_v62 = vmax.f32 %v1327_v34, %v1328_v17  ;;  %v2365_v3 = vpack.c.bf16 %v1295_v49, %v1294_v10  ;;  %v1529_v4 = vrot.slane %v1528_v44, 1 }
 0x13d   :  { %v1542_v39 = vrot.slane %v1541_v27, 4  ;;  %v1671_v16 = vrot.slane %v1670_v37, 4  ;;  %v1289_v42 = vmax.f32 %v1287_v29, %v1288_v36  ;;  %v1344_v43 = vmax.f32 %v1342_v47, %v1343_v38 }
 0x13e   :  { %v1658_v45 = vrot.slane %v1657_v52, 1  ;;  %v1530_v63 = vmax.f32 %v1528_v44, %v1529_v4  ;;  %v2368_v0 = vpack.c.bf16 %v1963_v56, %v1962_v9  ;;  %v2371_v21 = vpack.c.bf16 %v1967_v19, %v1966_v57 }
 0x13f   :  { %v1543_v46 = vmax.f32 %v1541_v27, %v1542_v39  ;;  %v1672_v48 = vmax.f32 %v1670_v37, %v1671_v16  ;;  %v1290_v50 = vrot.slane %v1289_v42, 1  ;;  %v1345_v54 = vrot.slane %v1344_v43, 1  ;;  %v1971_v39 = vld [vmem:[%s3096_s6] ss:$0 sm:$0xff] }
 0x140   :  { %v1659_v15 = vmax.f32 %v1657_v52, %v1658_v45  ;;  %v2374_v24 = vpack.c.bf16 %v1766_v55, %v1765_v23 }
 0x141   :  { %v1544_v58 = vrot.slane %v1543_v46, 2  ;;  %v1673_v59 = vrot.slane %v1672_v48, 2  ;;  %v1291_v61 = vmax.f32 %v1289_v42, %v1290_v50  ;;  %v1346_v2 = vmax.f32 %v1344_v43, %v1345_v54 }
 0x143   :  { %v1293_v6 = vsel %vm1292_vm2, %v1274_v60, %v1291_v61  ;;  %v1545_v7 = vmax.f32 %v1543_v46, %v1544_v58  ;;  %v1674_v8 = vmax.f32 %v1672_v48, %v1673_v59  ;;  %v1347_v5 = vsel %vm1292_vm2, %v1329_v62, %v1346_v2 }
 0x144   :  { %2257 = vmatmul.mubr.msk.f32.vlgmr.msra.gmra.mrb[16].mxu1 %vm1261_vm6, %v1347_v5 }
 0x145   :  { %v1546_v11 = vrot.slane %v1545_v7, 1  ;;  %v1675_v12 = vrot.slane %v1674_v8, 1  ;;  %2366 = vmatpush3.bf16.msra.mxu1 %v2365_v3  ;;  %2265 = vmatprep.mubr.msk.f32.mxu1 %vm2445_vm1, %v2444_v53 }
 0x146   :  { %2263 = vmatprep.subr.mxu1 %v2444_v53 }
 0x147   :  { %v1547_v14 = vmax.f32 %v1545_v7, %v1546_v11  ;;  %v1676_v33 = vmax.f32 %v1674_v8, %v1675_v12 }
 0x149   :  { %v1548_v18 = vsel %vm1292_vm2, %v1530_v63, %v1547_v14  ;;  %v1677_v40 = vsel %vm1292_vm2, %v1659_v15, %v1676_v33  ;;  %2264 = vmatpush3.msra.mxu1 %v1296_v13 }
 0x14a   :  { %2266 = vmatmul.mubr.msk.f32.vlgmr.msra.gmra.mrb[18].mxu1 %vm1261_vm6, %v1293_v6  ;;  %2367 = vmatprep.subr.bf16.mxu1 %v2443_v51 }
 0x14b   :  { %2369 = vmatpush3.bf16.msra.mxu1 %v2368_v0  ;;  %2274 = vmatprep.mubr.msk.f32.mxu1 %vm2445_vm1, %v2444_v53 }
 0x14c   :  { %2272 = vmatprep.subr.mxu1 %v2444_v53 }
 0x14f   :  { %2273 = vmatpush3.msra.mxu1 %v1964_v20 }
 0x150   :  { %2275 = vmatmul.mubr.msk.f32.vlgmr.msra.gmra.mrb[20].mxu1 %vm1261_vm6, %v1548_v18  ;;  %2370 = vmatprep.subr.bf16.mxu1 %v2443_v51 }
 0x151   :  { %2372 = vmatpush3.bf16.msra.mxu1 %v2371_v21  ;;  %2283 = vmatprep.mubr.msk.f32.mxu1 %vm2445_vm1, %v2444_v53 }
 0x152   :  { %2281 = vmatprep.subr.mxu1 %v2444_v53 }
 0x155   :  { %2282 = vmatpush3.msra.mxu1 %v1968_v22 }
 0x156   :  { %2284 = vmatmul.mubr.msk.f32.vlgmr.msra.gmra.mrb[22].mxu1 %vm1261_vm6, %v1677_v40  ;;  %2373 = vmatprep.subr.bf16.mxu1 %v2443_v51 }
 0x157   :  { %2294 = vmatprep.mubr.msk.f32.mxu1 %vm2445_vm1, %v2444_v53  ;;  %2375 = vmatpush3.bf16.msra.mxu1 %v2374_v24  ;;  %v1768_v53 = vld [vmem:[%s3095_s5 + $0x18] sm:$0xff] }
 0x158   :  { %2376 = vmatprep.subr.bf16.mxu1 %v2443_v51  ;;  %v2377_v26 = vpack.c.bf16 %v1768_v53, %v1767_v25  ;;  %v1970_v51 = vld [vmem:[%s3094_s4] ss:$0 sm:$0xff] }
 0x15b   :  { %2378 = vmatpush3.bf16.msra.mxu1 %v2377_v26 }
 0x217   :  { %v1421_v28 = vpop.f32.mrb[16].mxu1 }
 0x218   :  { %v2258_v29 = vpop.f32.mrb[17].mxu1 }
 0x21d   :  { %v1494_v30 = vpop.f32.mrb[18].mxu1 }
 0x21e   :  { %v1495_v31 = vadd.f32 %v1494_v30, %v1421_v28  ;;  %v2267_v32 = vpop.f32.mrb[19].mxu1 }
 0x223   :  { %v1622_v34 = vpop.f32.mrb[20].mxu1 }
 0x224   :  { %v1626_v35 = vadd.f32 %v1622_v34, %v1495_v31  ;;  %v2276_v47 = vpop.f32.mrb[21].mxu1 }
 0x229   :  { %v1751_v1 = vpop.f32.mrb[22].mxu1 }
 0x22a   :  { %v1755_v36 = vadd.f32 %v1751_v1, %v1626_v35  ;;  %v2285_v27 = vpop.f32.mrb[23].mxu1 }
 0x22c   :  { %v1763_v37 = vadd.f32 %v1970_v51, %v1755_v36 }
 0x22e   :  { %v1764_v38 = vmax.f32 %v1763_v37, 0.0 }
 0x230   :  { %2295 = vmatmul.mubr.msk.f32.vlgmr.msra.gmra.mrb[24].mxu1 %vm52_vm0, %v1764_v38 }
 0x303   :  { %v1845_v16 = vpop.f32.mrb[24].mxu1 }
 0x304   :  { %v1846_v41 = vadd.f32 %v1971_v39, %v1845_v16  ;;  %v2296_v42 = vpop.f32.mrb[25].mxu1 }
 0x306   :  { %1849 = vst [vmem:[#allocation2] sm:$0x3] %v1846_v41 }
 0x307   :  { %2430 = shalt.err (!%p2427_p4)
}
 0x308   :  { %s2431_s19 = scalar_lea.hbm %s3097_s7, 32 }
 0x309   :  { %p2432_p5 = scmp.ne.s32.totalorder %s3097_s7, %s2431_s19  ;;  %p2435_p6 = scmp.lt.u32.totalorder %s2431_s19, %s3097_s7 }
 0x30b   :  { %p2437_p7 = pnand %p2435_p6, %p2432_p5 }
 0x30d   :  { %2440 = shalt.err (!%p2437_p7)
}
 0x30e   :  { %1859 = dma.vmem_to_hbm [thread:$0]  %s1857_s16, 32, %s3097_s7, [#allocation3]  }
 0x30f   :  { %2441 = dma.done.wait [#allocation3], 32  }
 0x310   :  { %2442 = vsyncadd [#allocation3], 4294967264 }
 0x311   :  { %1863 = vsyncpa [#allocation3], 1 }

</bundles_post_ra>
